<compile_context>
chip_gen: v7x
topology: tpu7x:2x2x1
jax: 0.10.0
libtpu: 0.0.40
codegen_flags: <defaults>
</compile_context>

<pallas_src>
import jax
import jax.numpy as jnp
from jax import lax
from jax.experimental import pallas as pl
from jax.experimental.pallas import tpu as pltpu


def _round_up(n: int, m: int) -> int:
    return ((n + m - 1) // m) * m


def mlp_kernel(x_ref, w1_ref, w2_ref, b_ref, o_ref):
    # x_ref : [TB, dim]        (f32 tile; cast to bf16 for the MXU)
    # w1_ref: [hidden_p, dim]  (bf16, nn.Linear layout, NOT transposed)
    # w2_ref: [dim, hidden_p]  (bf16, nn.Linear layout, NOT transposed)
    # b_ref : [1, dim]         (f32)
    x = x_ref[...].astype(jnp.bfloat16)

    # hidden = relu(x @ W1^T): contract last dim of x with last dim of W1.
    h = lax.dot_general(
        x, w1_ref[...],
        dimension_numbers=(((1,), (1,)), ((), ())),
        preferred_element_type=jnp.float32,
    )
    h = jnp.maximum(h, 0.0).astype(jnp.bfloat16)

    # out = relu(hidden @ W2^T + bias): contract last dim of h with last dim of W2.
    y = lax.dot_general(
        h, w2_ref[...],
        dimension_numbers=(((1,), (1,)), ((), ())),
        preferred_element_type=jnp.float32,
    )
    y = jnp.maximum(y + b_ref[...], 0.0)   # bias [1, dim] broadcasts over rows
    o_ref[...] = y.astype(o_ref.dtype)


def prepare_params(W1, W2, bias):
    """One-time staging of parameters: bf16 MXU operands, hidden padded to 128.

    Padding the hidden axis is a mathematical no-op: padded hidden units are
    relu(0) = 0 and are multiplied by zero columns of W2p.
    """
    hidden, dim = W1.shape
    hidden_p = _round_up(hidden, 128)
    W1p = jnp.zeros((hidden_p, dim), jnp.bfloat16).at[:hidden, :].set(
        W1.astype(jnp.bfloat16))
    W2p = jnp.zeros((dim, hidden_p), jnp.bfloat16).at[:, :hidden].set(
        W2.astype(jnp.bfloat16))
    bias_p = bias.reshape(1, dim).astype(jnp.float32)
    return W1p, W2p, bias_p


def _choose_tb(B: int, tb_max: int) -> int:
    """Batch tile: multiple of 8, <= tb_max, and (when there is enough work)
    <= ~B/2 so the grid has >= 2 steps and v7x's two TensorCores both get
    batch tiles under dimension_semantics=('parallel',)."""
    b8 = _round_up(B, 8)
    if b8 <= 8:
        return 8
    half = _round_up(pl.cdiv(b8, 2), 8)
    return max(8, min(tb_max, half))


def mlp_forward(x, W1p, W2p, bias_p, *, tb: int = 1024):
    """x: [B, dim] (unpadded). W1p/W2p/bias_p come from prepare_params."""
    B, dim = x.shape
    hidden_p = W1p.shape[0]
    assert W1p.shape == (hidden_p, dim)
    assert W2p.shape == (dim, hidden_p)
    assert bias_p.shape == (1, dim)

    TB = _choose_tb(B, tb)
    grid = (pl.cdiv(B, TB),)

    return pl.pallas_call(
        mlp_kernel,
        out_shape=jax.ShapeDtypeStruct((B, dim), x.dtype),
        grid_spec=pl.GridSpec(
            grid=grid,
            in_specs=[
                pl.BlockSpec((TB, dim), lambda i: (i, 0)),        # x: streamed over batch
                pl.BlockSpec((hidden_p, dim), lambda i: (0, 0)),  # W1: VMEM-resident
                pl.BlockSpec((dim, hidden_p), lambda i: (0, 0)),  # W2: VMEM-resident
                pl.BlockSpec((1, dim), lambda i: (0, 0)),         # bias: VMEM-resident
            ],
            out_specs=pl.BlockSpec((TB, dim), lambda i: (i, 0)),
        ),
        compiler_params=pltpu.CompilerParams(
            dimension_semantics=("parallel",),   # disjoint batch tiles -> v7x 2-TC shard
        ),
    )(x, W1p, W2p, bias_p)


def mlp_reference_f32(x, W1, W2, bias):
    h = jnp.maximum(x @ W1.T, 0.0)
    return jnp.maximum(h @ W2.T + bias, 0.0)


def mlp_reference_bf16(x, W1, W2, bias):
    # Mirrors the kernel's numerics: bf16 operands, f32 accumulation.
    xb = x.astype(jnp.bfloat16)
    w1b = W1.astype(jnp.bfloat16)
    w2b = W2.astype(jnp.bfloat16)
    h = lax.dot_general(xb, w1b, (((1,), (1,)), ((), ())),
                        preferred_element_type=jnp.float32)
    h = jnp.maximum(h, 0.0).astype(jnp.bfloat16)
    y = lax.dot_general(h, w2b, (((1,), (1,)), ((), ())),
                        preferred_element_type=jnp.float32)
    return jnp.maximum(y + bias, 0.0)


if __name__ == "__main__":
    key = jax.random.PRNGKey(0)
    k_x, k_w1, k_w2, k_b = jax.random.split(key, 4)

    batch, dim, hidden_dim = 8, 32, 64

    # Deterministic parameter init (mimicking nn.Linear's uniform(-1/sqrt(fan_in), ...)).
    bound1 = 1.0 / (dim ** 0.5)
    bound2 = 1.0 / (hidden_dim ** 0.5)
    W1 = jax.random.uniform(k_w1, (hidden_dim, dim), jnp.float32, -bound1, bound1)
    W2 = jax.random.uniform(k_w2, (dim, hidden_dim), jnp.float32, -bound2, bound2)
    bias = jax.random.uniform(k_b, (dim,), jnp.float32, -bound2, bound2)

    x = jax.random.normal(k_x, (batch, dim), jnp.float32)

    # Stage parameters once, outside the hot path.
    W1p, W2p, bias_p = prepare_params(W1, W2, bias)

    out = jax.block_until_ready(mlp_forward(x, W1p, W2p, bias_p))
    assert out.shape == (batch, dim)

    # Loose check against the full-f32 reference (kernel uses bf16 MXU operands).
    ref32 = mlp_reference_f32(x, W1, W2, bias)
    assert jnp.allclose(out, ref32, atol=3e-2, rtol=3e-2)

    # Tight check against a reference with matching bf16-operand / f32-accum numerics.
    ref16 = mlp_reference_bf16(x, W1, W2, bias)
    assert jnp.allclose(out, ref16, atol=2e-3, rtol=2e-3)

    print("KERNEL_OK")
</pallas_src>

<mosaic_0001>
module attributes {stable_mosaic.version = 11 : i64} {
  func.func @mlp_kernel(%arg0: i32, %arg1: memref<8x32xf32, #tpu.memory_space<vmem>>, %arg2: memref<128x32xbf16, #tpu.memory_space<vmem>>, %arg3: memref<32x128xbf16, #tpu.memory_space<vmem>>, %arg4: memref<1x32xf32, #tpu.memory_space<vmem>>, %arg5: memref<8x32xf32, #tpu.memory_space<vmem>>) attributes {dimension_semantics = [#tpu.dimension_semantics<parallel>], iteration_bounds = array<i64: 1>, scalar_prefetch = 0 : i64, scratch_operands = 0 : i64, tpu.core_type = #tpu.core_type<tc>, window_params = [{transform_indices = @transform_0, window_bounds = array<i64: 8, 32>}, {pipeline_mode = #tpu.pipeline_mode<synchronous>, transform_indices = @transform_1, window_bounds = array<i64: 128, 32>}, {pipeline_mode = #tpu.pipeline_mode<synchronous>, transform_indices = @transform_2, window_bounds = array<i64: 32, 128>}, {pipeline_mode = #tpu.pipeline_mode<synchronous>, transform_indices = @transform_3, window_bounds = array<i64: 1, 32>}, {transform_indices = @transform_4, window_bounds = array<i64: 8, 32>}]} {
    %c0 = arith.constant 0 : index
    %c0_0 = arith.constant 0 : index
    %0 = vector.load %arg1[%c0, %c0_0] : memref<8x32xf32, #tpu.memory_space<vmem>>, vector<8x32xf32>
    %1 = arith.truncf %0 : vector<8x32xf32> to vector<8x32xbf16>
    %c0_1 = arith.constant 0 : index
    %c0_2 = arith.constant 0 : index
    %2 = vector.load %arg2[%c0_1, %c0_2] : memref<128x32xbf16, #tpu.memory_space<vmem>>, vector<128x32xbf16>
    %cst = arith.constant dense<0.000000e+00> : vector<8x128xf32>
    %3 = tpu.matmul %1, %2, %cst {dimension_numbers = #tpu.dot_dimension_numbers<[1], [1], [0], [0], [0, 0, 1, 0], [], []>} : vector<8x32xbf16>, vector<128x32xbf16>, vector<8x128xf32> -> vector<8x128xf32>
    %cst_3 = arith.constant 0.000000e+00 : f32
    %4 = vector.broadcast %cst_3 : f32 to vector<8x128xf32>
    %5 = arith.maximumf %3, %4 : vector<8x128xf32>
    %6 = arith.truncf %5 : vector<8x128xf32> to vector<8x128xbf16>
    %c0_4 = arith.constant 0 : index
    %c0_5 = arith.constant 0 : index
    %7 = vector.load %arg3[%c0_4, %c0_5] : memref<32x128xbf16, #tpu.memory_space<vmem>>, vector<32x128xbf16>
    %cst_6 = arith.constant dense<0.000000e+00> : vector<8x32xf32>
    %8 = tpu.matmul %6, %7, %cst_6 {dimension_numbers = #tpu.dot_dimension_numbers<[1], [1], [0], [0], [0, 0, 1, 0], [], []>} : vector<8x128xbf16>, vector<32x128xbf16>, vector<8x32xf32> -> vector<8x32xf32>
    %c0_7 = arith.constant 0 : index
    %c0_8 = arith.constant 0 : index
    %9 = vector.load %arg4[%c0_7, %c0_8] : memref<1x32xf32, #tpu.memory_space<vmem>>, vector<1x32xf32>
    %10 = vector.broadcast %9 : vector<1x32xf32> to vector<8x32xf32>
    %11 = arith.addf %8, %10 : vector<8x32xf32>
    %cst_9 = arith.constant 0.000000e+00 : f32
    %12 = vector.broadcast %cst_9 : f32 to vector<8x32xf32>
    %13 = arith.maximumf %11, %12 : vector<8x32xf32>
    %c0_10 = arith.constant 0 : index
    %c0_11 = arith.constant 0 : index
    %14 = vector.load %arg5[%c0_10, %c0_11] : memref<8x32xf32, #tpu.memory_space<vmem>>, vector<8x32xf32>
    tpu.vector_store %arg5[%c0_10, %c0_11], %13 {strides = array<i32>} : memref<8x32xf32, #tpu.memory_space<vmem>>, vector<8x32xf32>,
    return
  }
  func.func @transform_0(%arg0: i32) -> (i32, i32) {
    %c0_i32 = arith.constant 0 : i32
    %c0_i32_0 = arith.constant 0 : i32
    return %arg0, %c0_i32 : i32, i32
  }
  func.func @transform_1(%arg0: i32) -> (i32, i32) {
    %c0_i32 = arith.constant 0 : i32
    %c0_i32_0 = arith.constant 0 : i32
    %c0_i32_1 = arith.constant 0 : i32
    return %c0_i32, %c0_i32_0 : i32, i32
  }
  func.func @transform_2(%arg0: i32) -> (i32, i32) {
    %c0_i32 = arith.constant 0 : i32
    %c0_i32_0 = arith.constant 0 : i32
    %c0_i32_1 = arith.constant 0 : i32
    return %c0_i32, %c0_i32_0 : i32, i32
  }
  func.func @transform_3(%arg0: i32) -> (i32, i32) {
    %c0_i32 = arith.constant 0 : i32
    %c0_i32_0 = arith.constant 0 : i32
    %c0_i32_1 = arith.constant 0 : i32
    return %c0_i32, %c0_i32_0 : i32, i32
  }
  func.func @transform_4(%arg0: i32) -> (i32, i32) {
    %c0_i32 = arith.constant 0 : i32
    %c0_i32_0 = arith.constant 0 : i32
    return %arg0, %c0_i32 : i32, i32
  }
}

</mosaic_0001>

<bundles_post_ra>
// kernel: tpu_custom_call.1
= control target key start
LH: loop header
LB: loop body
LE: loop exit
PB: predicated region body
PF: predicated region fallthrough
CT: control target
= control target key end

     0   :  { %v315_v1 = vmov 0.0   ;;  %vm77_vm0 = vcmask 261120   ;;  %vm316_vm1 = vmmov 0   ;;  %s401_s0 = inlined_call_operand.vmem [shape: f32[8,32], index: 0, kind: input, shape index: {}]   ;;  %s402_s1 = inlined_call_operand.vmem [shape: bf16[128,32], index: 1, kind: input, shape index: {}]   ;;  %s403_s2 = inlined_call_operand.vmem [shape: bf16[32,128], index: 2, kind: input, shape index: {}]   ;;  %s404_s3 = inlined_call_operand.vmem [shape: f32[1,32], index: 3, kind: input, shape index: {}]   ;;  %s405_s4 = inlined_call_operand.hbm [shape: f32[8,32], index: 4, kind: output, shape index: {}]  }
   0x1   :  { %v281_v0 = vld [vmem:[%s402_s1] sm:$0xff]   ;;  %250 = vmatprep.subr.bf16.mxu0 %v315_v1  ;;  %270 = vmatprep.subr.bf16.mxu1 %v315_v1  ;;  %v282_v3 = vld [vmem:[%s402_s1 + $0x8] sm:$0xff]  }
   0x2   :  { %v82_v2 = vsel %vm77_vm0, %v281_v0, 0  ;;  %v85_v4 = vsel %vm77_vm0, %v282_v3, 0  ;;  %v289_v5 = vld [vmem:[%s403_s2] sm:$0xff]   ;;  %266 = vmatprep.mubr.msk.bf16.mxu0 %vm316_vm1, %v315_v1  ;;  %274 = vmatprep.mubr.msk.bf16.mxu1 %vm316_vm1, %v315_v1 }
   0x3   :  { %251 = vmatpush3.bf16.xpose.msra.mxu0 %v82_v2  ;;  %271 = vmatpush3.bf16.xpose.msra.mxu1 %v289_v5 }
   0x4   :  { %252 = vmatprep.subr.bf16.mxu0 %v315_v1 }
   0x5   :  { %9 = vsyncpa [#allocation3], 0  ;;  %272 = vmatprep.subr.bf16.mxu1 %v315_v1  ;;  %v283_v6 = vld [vmem:[%s402_s1 + $0x10] sm:$0xff]   ;;  %v290_v7 = vld [vmem:[%s403_s2 + $0x8] sm:$0xff]  }
   0x6   :  { %v88_v8 = vsel %vm77_vm0, %v283_v6, 0  ;;  %v284_v9 = vld [vmem:[%s402_s1 + $0x18] sm:$0xff]   ;;  %v285_v11 = vld [vmem:[%s402_s1 + $0x20] sm:$0xff]   ;;  %v286_v13 = vld [vmem:[%s402_s1 + $0x28] sm:$0xff]  }
   0x7   :  { %v91_v10 = vsel %vm77_vm0, %v284_v9, 0  ;;  %v94_v12 = vsel %vm77_vm0, %v285_v11, 0  ;;  %v97_v14 = vsel %vm77_vm0, %v286_v13, 0  ;;  %v287_v15 = vld [vmem:[%s402_s1 + $0x30] sm:$0xff]   ;;  %v288_v17 = vld [vmem:[%s402_s1 + $0x38] sm:$0xff]   ;;  %v19_v19 = vld [vmem:[%s401_s0] sm:$0xff] }
   0x8   :  { %v100_v16 = vsel %vm77_vm0, %v287_v15, 0  ;;  %v103_v18 = vsel %vm77_vm0, %v288_v17, 0  ;;  %v20_v20 = vpack.c.bf16 %v19_v19, %v19_v19  ;;  %v235_v27 = vld [vmem:[%s404_s3] ss:$0 sm:$0xff]  ;;  %s317_s1 = smov [#allocation2]  }
   0x9   :  { %s218_s12 = sshll.u32 %s317_s1, 4  ;;  %s219_s12 = int_to_ptr.vmem [resolvable:$true] %s218_s12 }
   0xa   :  { %s291_s0 = scalar_lea.vmem %s219_s12, 128  ;;  %p296_p1 = scmp.lt.s32.totalorder %s219_s12, %s219_s12 }
   0xb   :  { %253 = vmatpush3.bf16.xpose.msra.mxu0 %v85_v4  ;;  %273 = vmatpush3.bf16.xpose.msra.mxu1 %v290_v7  ;;  %p292_p0 = scmp.ne.s32.totalorder %s219_s12, %s291_s0  ;;  %p297_p2 = scmp.lt.s32.totalorder %s291_s0, %s291_s0 }
   0xc   :  { %254 = vmatprep.subr.bf16.mxu0 %v315_v1 }
   0xd   :  { %p298_p3 = por %p297_p2, %p296_p1 }
   0xf   :  { %p299_p4 = pnand %p298_p3, %p292_p0 }
  0x13   :  { %255 = vmatpush3.bf16.xpose.msra.mxu0 %v88_v8 }
  0x14   :  { %256 = vmatprep.subr.bf16.mxu0 %v315_v1 }
  0x1b   :  { %257 = vmatpush3.bf16.xpose.msra.mxu0 %v91_v10 }
  0x1c   :  { %258 = vmatprep.subr.bf16.mxu0 %v315_v1 }
  0x23   :  { %259 = vmatpush3.bf16.xpose.msra.mxu0 %v94_v12 }
  0x24   :  { %260 = vmatprep.subr.bf16.mxu0 %v315_v1 }
  0x2b   :  { %261 = vmatpush3.bf16.xpose.msra.mxu0 %v97_v14 }
  0x2c   :  { %262 = vmatprep.subr.bf16.mxu0 %v315_v1 }
  0x33   :  { %263 = vmatpush3.bf16.xpose.msra.mxu0 %v100_v16 }
  0x34   :  { %264 = vmatprep.subr.bf16.mxu0 %v315_v1 }
  0x3b   :  { %265 = vmatpush3.bf16.xpose.msra.mxu0 %v103_v18 }
  0x42   :  { %267 = vmatmul.mubr.msk.bf16.vlgmr.msra.gmra.mrb[0].mxu0 %vm77_vm0, %v20_v20 }
 0x115   :  { %v139_v21 = vpop.f32.mrb[0].mxu0 }
 0x116   :  { %v145_v22 = vmax.f32 %v139_v21, 0.0  ;;  %v268_v23 = vpop.f32.mrb[1].mxu0 }
 0x117   :  { %v142_v24 = vpop.f32.mrb[2].mxu0 }
 0x118   :  { %v146_v25 = vpack.c.bf16 %v145_v22, %v145_v22  ;;  %v269_v26 = vpop.f32.mrb[3].mxu0 }
 0x11a   :  { %275 = vmatmul.mubr.bf16.vlgmr.msra.gmra.mrb[0].mxu1 %v146_v25 }
 0x1ed   :  { %v204_v28 = vpop.f32.mrb[0].mxu1 }
 0x1ee   :  { %v205_v29 = vadd.f32 %v235_v27, %v204_v28  ;;  %v276_v30 = vpop.f32.mrb[1].mxu1 }
 0x1ef   :  { %v207_v31 = vpop.f32.mrb[2].mxu1 }
 0x1f0   :  { %v210_v32 = vmax.f32 %v205_v29, 0.0  ;;  %v277_v33 = vpop.f32.mrb[3].mxu1 }
 0x1f2   :  { %211 = vst.msk [vmem:[#allocation2] sm:$0xff] %vm77_vm0, %v210_v32 }
 0x1f3   :  { %302 = shalt.err (!%p299_p4)
}
 0x1f4   :  { %s303_s14 = scalar_lea.hbm %s405_s4, 128 }
 0x1f5   :  { %p304_p5 = scmp.ne.s32.totalorder %s405_s4, %s303_s14  ;;  %p307_p6 = scmp.lt.u32.totalorder %s303_s14, %s405_s4 }
 0x1f7   :  { %p309_p7 = pnand %p307_p6, %p304_p5 }
 0x1f9   :  { %312 = shalt.err (!%p309_p7)
}
 0x1fa   :  { %221 = dma.vmem_to_hbm [thread:$0]  %s219_s12, 128, %s405_s4, [#allocation3]  }
 0x1fb   :  { %313 = dma.done.wait [#allocation3], 128  }
 0x1fc   :  { %314 = vsyncadd [#allocation3], 4294967168 }
 0x1fd   :  { %225 = vsyncpa [#allocation3], 1 }

</bundles_post_ra>
